<compile_context>
chip_gen: v7x
topology: tpu7x:2x2x1
jax: 0.10.0
libtpu: 0.0.40
codegen_flags: <defaults>
</compile_context>

<pallas_src>
import functools

import jax
import jax.numpy as jnp
from jax.experimental import pallas as pl
from jax.experimental.pallas import tpu as pltpu


LANE = 512                   # lane-dense last dim (multiple of 128 -> unmasked vst)
TARGET_TILE_BYTES = 2 << 20  # ~2 MiB per buffer; in+out double-buffered ~= 8 MiB
MIN_GRID_STEPS = 4           # keep >=4 row tiles when possible (v7x 2-TC split)
VMEM_LIMIT_BYTES = 32 << 20  # safe headroom on v5e/v6e (128 MiB phys) and v7x (64 MiB)


def _round_up(x: int, m: int) -> int:
    return ((x + m - 1) // m) * m


def _min_sublane(dtype) -> int:
    # Packed sublane minimum: f32 -> 8, bf16 -> 16, int8/fp8 -> 32.
    return {4: 8, 2: 16, 1: 32}[jnp.dtype(dtype).itemsize]


def _choose_block_rows(rows: int, dtype) -> int:
    sub = _min_sublane(dtype)
    itemsize = jnp.dtype(dtype).itemsize
    cap = max(sub, (TARGET_TILE_BYTES // (LANE * itemsize)) // sub * sub)
    want = _round_up(pl.cdiv(rows, MIN_GRID_STEPS), sub)
    block_rows = min(cap, want)
    if block_rows >= rows:
        # Single block whose dims equal the full array dims -> always legal,
        # no masking needed.
        return rows
    return block_rows


# ----------------------------- kernels --------------------------------------

def _static_kernel(x_ref, o_ref, *, transform_id: int):
    """Statically selected transform (host-side choice): one branch only."""
    x = x_ref[...]
    if transform_id == 1:        # brightness / contrast
        o_ref[...] = x * 1.5 + 0.1
    elif transform_id == 2:      # invert
        o_ref[...] = 1.0 - x
    else:                        # identity (normally skipped in the wrapper)
        o_ref[...] = x


def _traced_kernel(tid_ref, x_ref, o_ref):
    """Traced transform id (scalar prefetch in SMEM); branch with pl.when."""
    tid = tid_ref[0]
    x = x_ref[...]

    @pl.when(tid == 0)
    def _():
        o_ref[...] = x

    @pl.when(tid == 1)
    def _():
        o_ref[...] = x * 1.5 + 0.1

    @pl.when(tid == 2)
    def _():
        o_ref[...] = 1.0 - x


# ----------------------------- wrappers -------------------------------------

def _as_lane_dense(images: jax.Array):
    """Flatten to a (rows, LANE) slab.

    Free (contiguous reshape / bitcast) when images.size % LANE == 0 — the
    common case for image batches.  Returns (slab, original_size_or_None).
    """
    total = images.size
    if total % LANE == 0:
        return images.reshape(total // LANE, LANE), None
    # TODO(synk): ragged fallback costs one extra HBM pass for the pad+slice.
    rows = pl.cdiv(total, LANE)
    flat = jnp.pad(images.reshape(-1), (0, rows * LANE - total))
    return flat.reshape(rows, LANE), total


def _launch(x2d, kernel, *, num_scalar_prefetch, scalar_args, donate):
    rows, _ = x2d.shape
    dtype = x2d.dtype
    block_rows = _choose_block_rows(rows, dtype)
    grid = (pl.cdiv(rows, block_rows),)

    n = rows * LANE
    itemsize = jnp.dtype(dtype).itemsize
    cost = pl.CostEstimate(flops=4 * n, transcendentals=0,
                           bytes_accessed=2 * n * itemsize)

    if num_scalar_prefetch == 1:
        idx_map = lambda i, tid: (i, 0)
    else:
        idx_map = lambda i: (i, 0)

    aliases = {num_scalar_prefetch: 0} if donate else {}

    return pl.pallas_call(
        kernel,
        out_shape=jax.ShapeDtypeStruct((rows, LANE), dtype),
        grid_spec=pltpu.PrefetchScalarGridSpec(
            num_scalar_prefetch=num_scalar_prefetch,
            grid=grid,
            in_specs=[pl.BlockSpec((block_rows, LANE), idx_map)],
            out_specs=pl.BlockSpec((block_rows, LANE), idx_map),
        ),
        compiler_params=pltpu.CompilerParams(
            dimension_semantics=("parallel",),      # v7x: shard tiles over 2 TCs
            vmem_limit_bytes=VMEM_LIMIT_BYTES),
        cost_estimate=cost,
        input_output_aliases=aliases,
    )(*scalar_args, x2d)


def _check_dtype(images):
    if not jnp.issubdtype(images.dtype, jnp.floating):
        raise TypeError("RandomChoice transforms expect a floating dtype "
                        f"(got {images.dtype}); cast before calling.")


def apply_static(images: jax.Array, transform_id: int, *, donate: bool = False):
    """Apply transform `transform_id` (static Python int). Identity is free."""
    transform_id = int(transform_id)
    if transform_id == 0:
        return images            # zero kernel launch, zero HBM traffic
    _check_dtype(images)
    x2d, total = _as_lane_dense(images)
    kernel = functools.partial(_static_kernel, transform_id=transform_id)
    out2d = _launch(x2d, kernel, num_scalar_prefetch=0, scalar_args=(),
                    donate=donate and total is None)
    if total is not None:
        return out2d.reshape(-1)[:total].reshape(images.shape)
    return out2d.reshape(images.shape)


def apply_traced(images: jax.Array, transform_id, *, donate: bool = False):
    """Apply transform selected by a traced int32 (jit/vmap friendly)."""
    _check_dtype(images)
    tid = jnp.asarray(transform_id, dtype=jnp.int32).reshape(1)
    x2d, total = _as_lane_dense(images)
    out2d = _launch(x2d, _traced_kernel, num_scalar_prefetch=1,
                    scalar_args=(tid,), donate=donate and total is None)
    if total is not None:
        return out2d.reshape(-1)[:total].reshape(images.shape)
    return out2d.reshape(images.shape)


class RandomChoicePallas:
    """JAX/Pallas equivalent of the PyTorch RandomChoice module."""

    # TODO(synk): the PyTorch module takes an arbitrary nn.ModuleList; three
    # representative elementwise transforms are baked into the kernel here.
    NUM_TRANSFORMS = 3  # identity, brightness, invert

    def __init__(self, probabilities=None):
        if probabilities is None:
            probabilities = [1.0 / self.NUM_TRANSFORMS] * self.NUM_TRANSFORMS
        assert len(probabilities) == self.NUM_TRANSFORMS, \
            "Mismatch between transforms and probabilities"
        assert abs(sum(probabilities) - 1.0) < 1e-6, "Probabilities must sum to 1"
        self.probabilities = jnp.asarray(probabilities, dtype=jnp.float32)

    def __call__(self, images: jax.Array, key: jax.Array) -> jax.Array:
        # Jit-friendly path: the drawn index stays on device (scalar prefetch
        # + in-kernel branch), no device->host sync per call.
        idx = jax.random.choice(key, self.NUM_TRANSFORMS, p=self.probabilities)
        return apply_traced(images, idx)

    def call_host(self, images: jax.Array, key: jax.Array) -> jax.Array:
        # Eager, PyTorch-parity path: realize the choice on the host so the
        # identity branch skips the kernel launch (and all HBM traffic).
        idx = int(jax.random.choice(key, self.NUM_TRANSFORMS,
                                    p=self.probabilities))
        return apply_static(images, idx)


if __name__ == "__main__":
    key = jax.random.PRNGKey(0)
    k_img, k_choice = jax.random.split(key)

    # Small NCHW image batch, consistent with a StyleGAN2 augmentation input.
    images = jax.random.uniform(k_img, (2, 4, 16, 16), dtype=jnp.float32)
    ref_all = [images, images * 1.5 + 0.1, 1.0 - images]

    # 1) Static (host-choice) kernel path — all three transform ids.
    for tid in (0, 1, 2):
        got = jax.block_until_ready(apply_static(images, tid))
        assert got.shape == images.shape and got.dtype == images.dtype
        assert jnp.allclose(got, ref_all[tid], atol=1e-6)

    # 2) Traced (scalar-prefetch) kernel path under jit — all three ids.
    jit_apply = jax.jit(apply_traced)
    for tid in (0, 1, 2):
        got = jax.block_until_ready(jit_apply(images, jnp.int32(tid)))
        assert got.shape == images.shape and got.dtype == images.dtype
        assert jnp.allclose(got, ref_all[tid], atol=1e-6)

    # 3) Module path, end-to-end under jit (choice drawn on device).
    probs = [0.5, 0.3, 0.2]
    module = RandomChoicePallas(probabilities=probs)
    out = jax.block_until_ready(jax.jit(module.__call__)(images, k_choice))
    idx = int(jax.random.choice(k_choice, 3, p=jnp.asarray(probs, jnp.float32)))
    assert out.shape == images.shape and out.dtype == images.dtype
    assert jnp.allclose(out, ref_all[idx], atol=1e-6)

    # 4) Host-parity module path (identity branch skips the kernel launch).
    out_h = jax.block_until_ready(module.call_host(images, k_choice))
    assert jnp.allclose(out_h, ref_all[idx], atol=1e-6)

    print("KERNEL_OK")
</pallas_src>

<mosaic_0001>
module attributes {stable_mosaic.version = 11 : i64} {
  func.func @_static_kernel(%arg0: i32, %arg1: memref<4x512xf32, #tpu.memory_space<vmem>>, %arg2: memref<4x512xf32, #tpu.memory_space<vmem>>) attributes {dimension_semantics = [#tpu.dimension_semantics<parallel>], iteration_bounds = array<i64: 1>, scalar_prefetch = 0 : i64, scratch_operands = 0 : i64, tpu.core_type = #tpu.core_type<tc>, window_params = [{transform_indices = @transform_0, window_bounds = array<i64: 4, 512>}, {transform_indices = @transform_1, window_bounds = array<i64: 4, 512>}]} {
    %c0 = arith.constant 0 : index
    %c0_0 = arith.constant 0 : index
    %0 = vector.load %arg1[%c0, %c0_0] : memref<4x512xf32, #tpu.memory_space<vmem>>, vector<4x512xf32>
    %cst = arith.constant 1.500000e+00 : f32
    %1 = vector.broadcast %cst : f32 to vector<4x512xf32>
    %2 = arith.mulf %0, %1 : vector<4x512xf32>
    %cst_1 = arith.constant 1.000000e-01 : f32
    %3 = vector.broadcast %cst_1 : f32 to vector<4x512xf32>
    %4 = arith.addf %2, %3 : vector<4x512xf32>
    %c0_2 = arith.constant 0 : index
    %c0_3 = arith.constant 0 : index
    %5 = vector.load %arg2[%c0_2, %c0_3] : memref<4x512xf32, #tpu.memory_space<vmem>>, vector<4x512xf32>
    tpu.vector_store %arg2[%c0_2, %c0_3], %4 {strides = array<i32>} : memref<4x512xf32, #tpu.memory_space<vmem>>, vector<4x512xf32>,
    return
  }
  func.func @transform_0(%arg0: i32) -> (i32, i32) {
    %c0_i32 = arith.constant 0 : i32
    %c0_i32_0 = arith.constant 0 : i32
    return %arg0, %c0_i32 : i32, i32
  }
  func.func @transform_1(%arg0: i32) -> (i32, i32) {
    %c0_i32 = arith.constant 0 : i32
    %c0_i32_0 = arith.constant 0 : i32
    return %arg0, %c0_i32 : i32, i32
  }
}

</mosaic_0001>

<bundles_post_ra>
// kernel: tpu_custom_call.1
= control target key start
LH: loop header
LB: loop body
LE: loop exit
PB: predicated region body
PF: predicated region fallthrough
CT: control target
= control target key end

     0   :  { %6 = vsyncpa [#allocation3], 0  ;;  %s130_s0 = inlined_call_operand.hbm [shape: f32[4,512], index: 0, kind: input, shape index: {}]   ;;  %s131_s1 = inlined_call_operand.hbm [shape: f32[4,512], index: 1, kind: output, shape index: {}]  }
   0x1   :  { %7 = vsyncpa [#allocation4], 0  ;;  %s94_s6 = smov [#allocation2]   ;;  %s46_s10 = scalar_lea.hbm %s130_s0, 256 }
   0x2   :  { %s14_s7 = sshll.u32 %s94_s6, 4  ;;  %p47_p0 = scmp.ne.s32.totalorder %s130_s0, %s46_s10  ;;  %s15_s7 = int_to_ptr.vmem [resolvable:$true] %s14_s7 }
   0x3   :  { %p50_p1 = scmp.lt.u32.totalorder %s46_s10, %s130_s0 }
   0x5   :  { %p52_p2 = pnand %p50_p1, %p47_p0 }
   0x7   :  { %55 = shalt.err (!%p52_p2)
}
   0x8   :  { %s56_s15 = scalar_lea.vmem %s15_s7, 256  ;;  %p61_p4 = scmp.lt.s32.totalorder %s15_s7, %s15_s7 }
   0x9   :  { %p57_p3 = scmp.ne.s32.totalorder %s15_s7, %s56_s15  ;;  %p62_p5 = scmp.lt.s32.totalorder %s56_s15, %s56_s15 }
   0xb   :  { %p63_p6 = por %p62_p5, %p61_p4 }
   0xd   :  { %p64_p7 = pnand %p63_p6, %p57_p3 }
   0xf   :  { %67 = shalt.err (!%p64_p7)
}
  0x10   :  { %17 = dma.hbm_to_vmem [thread:$0]  %s130_s0, 256, %s15_s7, [#allocation3]  }
  0x11   :  { %90 = dma.done.wait [#allocation3], 256  }
  0x12   :  { %91 = vsyncadd [#allocation3], 4294967040  ;;  %v21_v0 = vld [vmem:[#allocation2] sm:$0xff]  ;;  %v22_v1 = vld [vmem:[#allocation2 + $0x8] sm:$0xff]  ;;  %s95_s18 = smov [#allocation5]  }
  0x13   :  { %s35_s19 = sshll.u32 %s95_s18, 4  ;;  %v23_v2 = vmul.f32 1.5, %v21_v0  ;;  %v24_v3 = vmul.f32 1.5, %v22_v1  ;;  %s36_s19 = int_to_ptr.vmem [resolvable:$true] %s35_s19 }
  0x14   :  { %s68_s20 = scalar_lea.vmem %s36_s19, 256  ;;  %p73_p9 = scmp.lt.s32.totalorder %s36_s19, %s36_s19 }
  0x15   :  { %v25_v4 = vadd.f32 0.1, %v23_v2  ;;  %v26_v5 = vadd.f32 0.1, %v24_v3  ;;  %p69_p8 = scmp.ne.s32.totalorder %s36_s19, %s68_s20  ;;  %p74_p10 = scmp.lt.s32.totalorder %s68_s20, %s68_s20 }
  0x17   :  { %27 = vst [vmem:[#allocation5] sm:$0xff] %v25_v4  ;;  %28 = vst [vmem:[#allocation5 + $0x8] sm:$0xff] %v26_v5  ;;  %p75_p11 = por %p74_p10, %p73_p9 }
  0x19   :  { %p76_p12 = pnand %p75_p11, %p69_p8 }
  0x1b   :  { %79 = shalt.err (!%p76_p12)
}
  0x1c   :  { %s80_s22 = scalar_lea.hbm %s131_s1, 256 }
  0x1d   :  { %p81_p13 = scmp.ne.s32.totalorder %s131_s1, %s80_s22  ;;  %p84_p0 = scmp.lt.u32.totalorder %s80_s22, %s131_s1 }
  0x1f   :  { %p86_p1 = pnand %p84_p0, %p81_p13 }
  0x21   :  { %89 = shalt.err (!%p86_p1)
}
  0x22   :  { %38 = dma.vmem_to_hbm [thread:$0]  %s36_s19, 256, %s131_s1, [#allocation4]  }
  0x23   :  { %92 = dma.done.wait [#allocation4], 256  }
  0x24   :  { %93 = vsyncadd [#allocation4], 4294967040 }
  0x25   :  { %42 = vsyncpa [#allocation3], 1 }
  0x26   :  { %43 = vsyncpa [#allocation4], 1 }

</bundles_post_ra>
